<compile_context>
chip_gen: v5e
topology: v5e:2x2
jax: 0.10.0
libtpu: 0.0.40
codegen_flags: <defaults>
</compile_context>

<pallas_src>
import jax
import jax.numpy as jnp
from jax.experimental import pallas as pl
from jax.experimental.pallas import tpu as pltpu


# ----------------------------------------------------------------------------
# Helpers
# ----------------------------------------------------------------------------
def _round_up(x, m):
    return ((x + m - 1) // m) * m


def _vmem_capacity_bytes():
    """Physical VMEM per core (v5e/v6e: 128 MiB, v7x: 64 MiB per TC)."""
    try:
        info = pltpu.get_tpu_info()
        cap = getattr(info, "vmem_capacity_bytes", None)
        if cap:
            return int(cap)
    except Exception:
        pass
    return 64 << 20  # conservative fallback (v7x per-TC VMEM)


def _choose_blocks(B, C, N, HW, in_bytes, out_bytes):
    """Pick (b_blk, tile_hw) so the double-buffered I/O slabs fit a per-chip
    VMEM budget and the grid has >= 2 steps whenever something can be split
    (megacore on v7x)."""
    cap = _vmem_capacity_bytes()
    # Budget for the pipelined input/output slabs (weight/bias/compiler scratch
    # get the remaining headroom).  ~25 MiB on v7x, 48 MiB on v5e/v6e.
    budget = min(int(cap * 0.4), 48 << 20)

    c_pad = _round_up(C, 8)
    n_pad = _round_up(N, 8)
    hw_pad = _round_up(HW, 128)

    # Per-pixel-lane cost of the double-buffered input + output columns.
    bytes_per_lane = 2 * (c_pad * in_bytes + n_pad * out_bytes)
    # Whole-frame (single-buffer) I/O footprint.
    frame_io_bytes = hw_pad * (c_pad * in_bytes + n_pad * out_bytes)

    if frame_io_bytes <= (1 << 20) and B > 1:
        # Small-HW regime: pack several whole frames into one grid step to
        # amortize per-step overhead and tiny DMAs.
        tile_hw = HW
        max_frames = max(1, budget // max(2 * frame_io_bytes, 1))
        b_blk = int(min(B, max_frames, 8))   # cap the in-kernel unrolled loop
        if b_blk >= B and B > 1:
            # Keep >= 2 grid steps so both v7x TensorCores get work.
            b_blk = (B + 1) // 2
        return b_blk, tile_hw

    # Large-HW regime (or single-frame batch): one frame per step, pixel-tile
    # the lane axis as large as the VMEM budget allows.
    b_blk = 1
    budget_lanes = max(128, budget // max(bytes_per_lane, 1))
    tile_cap = 16384  # bound per-step latency; large caps help small-C maps
    if hw_pad <= min(budget_lanes, tile_cap):
        tile_hw = HW                               # full-dim block (always legal)
    else:
        tile_hw = max(128, (min(tile_cap, budget_lanes) // 128) * 128)

    # Guarantee >= 2 grid steps when splitting is possible (v7x megacore).
    n_hw_blocks = -(-HW // tile_hw)
    if B * n_hw_blocks < 2 and HW > 128:
        half = -(-HW // 2)
        tile_hw = min(tile_hw, max(128, _round_up(half, 128)))
    return b_blk, tile_hw


# ----------------------------------------------------------------------------
# Pallas kernel: per-pixel linear classifier (1x1 conv == matmul over channels)
# ----------------------------------------------------------------------------
def _cls_seg_kernel(x_ref, w_ref, b_ref, o_ref):
    # x_ref : (b_blk, C, tile_hw)   pixel tiles, pixels on the lane axis
    # w_ref : (N, C)                full conv_seg weight (resident, fetched once)
    # b_ref : (N, 1)                conv_seg bias (f32), broadcast over lanes
    # o_ref : (b_blk, N, tile_hw)   logits (lane-dense store)
    w = w_ref[...]
    bias = b_ref[...]
    for i in range(x_ref.shape[0]):            # static, small (<= 8 frames/step)
        acc = jnp.dot(w, x_ref[i], preferred_element_type=jnp.float32)
        o_ref[i] = (acc + bias).astype(o_ref.dtype)


def cls_seg_pallas(feat_nchw, weight, bias):
    """Apply conv_seg (1x1 conv) to an NCHW feature map via a Pallas kernel.

    feat_nchw : [B, C, H, W]
    weight    : [num_classes, C]  (squeezed 1x1 conv kernel)
    bias      : [num_classes]
    returns   : [B, num_classes, H, W]  (same dtype as feat_nchw)
    """
    B, C, H, W = feat_nchw.shape
    N = weight.shape[0]
    HW = H * W
    out_dtype = feat_nchw.dtype
    in_bytes = feat_nchw.dtype.itemsize
    out_bytes = jnp.dtype(out_dtype).itemsize

    # NCHW -> [B, C, H*W]: contiguous reshape, no data movement.
    x = feat_nchw.reshape(B, C, HW)
    # Match weight dtype to features so bf16 feats use the native bf16 MXU path.
    w = weight.astype(feat_nchw.dtype)            # [N, C]
    b = bias.reshape(N, 1).astype(jnp.float32)    # f32 bias onto f32 accumulator

    b_blk, tile_hw = _choose_blocks(B, C, N, HW, in_bytes, out_bytes)
    grid = (pl.cdiv(B, b_blk), pl.cdiv(HW, tile_hw))

    # Explicit scoped-VMEM limit from the actual (padded) buffers + headroom.
    c_pad = _round_up(C, 8)
    n_pad = _round_up(N, 8)
    thw_pad = _round_up(tile_hw, 128)
    vmem_need = (
        2 * b_blk * c_pad * thw_pad * in_bytes        # input double buffer
        + 2 * b_blk * n_pad * thw_pad * out_bytes     # output double buffer
        + n_pad * _round_up(C, 128) * w.dtype.itemsize  # resident weight
        + n_pad * 128 * 4                             # resident bias
    )
    vmem_limit = int(min(_vmem_capacity_bytes(),
                         max(int(vmem_need * 1.25) + (2 << 20), 16 << 20)))

    # Advisory cost estimate for XLA scheduling around this mem-bound call.
    bytes_accessed = (
        in_bytes * B * C * HW
        + w.dtype.itemsize * N * C
        + 4 * N
        + out_bytes * B * N * HW
    )
    cost = pl.CostEstimate(
        flops=2 * B * HW * C * N,
        transcendentals=0,
        bytes_accessed=int(bytes_accessed),
    )

    out = pl.pallas_call(
        _cls_seg_kernel,
        out_shape=jax.ShapeDtypeStruct((B, N, HW), out_dtype),
        grid=grid,
        in_specs=[
            # Pixel/frame tile: b_blk frames, pixels on the lane axis.
            pl.BlockSpec((b_blk, C, tile_hw), lambda bi, pi: (bi, 0, pi)),
            # Full weight / bias: constant index_map -> fetched once, resident.
            pl.BlockSpec((N, C), lambda bi, pi: (0, 0)),
            pl.BlockSpec((N, 1), lambda bi, pi: (0, 0)),
        ],
        out_specs=pl.BlockSpec((b_blk, N, tile_hw), lambda bi, pi: (bi, 0, pi)),
        compiler_params=pltpu.CompilerParams(
            dimension_semantics=("parallel", "parallel"),
            vmem_limit_bytes=vmem_limit,
        ),
        cost_estimate=cost,
    )(x, w, b)

    # [B, N, H*W] -> [B, N, H, W]: contiguous reshape, no data movement.
    return out.reshape(B, N, H, W)


# ----------------------------------------------------------------------------
# Module wrapper (glue in plain JAX)
# ----------------------------------------------------------------------------
class BaseDecodeHeadClipsPallas:
    """JAX/Pallas analogue of BaseDecodeHead_clips' concrete forward compute.

    input_transform=None (single feature-map select), eval-mode dropout.
    """

    def __init__(self, in_channels, channels, *, num_classes,
                 dropout_ratio=0.1, in_index=-1, num_clips=5):
        assert isinstance(in_channels, int) and isinstance(in_index, int)
        self.in_channels = in_channels
        self.channels = channels
        self.num_classes = num_classes
        self.dropout_ratio = dropout_ratio
        self.in_index = in_index
        self.num_clips = num_clips

        # Deterministic init of conv_seg (normal_init mean=0, std=0.01), bias=0.
        kw, _ = jax.random.split(jax.random.PRNGKey(0))
        self.conv_seg_weight = 0.01 * jax.random.normal(
            kw, (num_classes, channels), dtype=jnp.float32)
        self.conv_seg_bias = jnp.zeros((num_classes,), dtype=jnp.float32)

    def _transform_inputs(self, inputs):
        # input_transform is None -> select one level.
        return inputs[self.in_index]

    def cls_seg(self, feat):
        # Dropout2d is identity in eval mode; the 1x1 conv_seg is the Pallas
        # hot path.
        # TODO(synk): training-mode channel dropout (Dropout2d) not implemented.
        return cls_seg_pallas(feat, self.conv_seg_weight, self.conv_seg_bias)

    def forward(self, inputs, batch_size=None, num_clips=None):
        # The base class leaves `forward` abstract; the concrete per-pixel
        # compute it defines is transform-select + cls_seg, which we run here.
        feat = self._transform_inputs(inputs)   # [B*num_clips, channels, H, W]
        return self.cls_seg(feat)               # [B*num_clips, num_classes, H, W]


# ----------------------------------------------------------------------------
# Reference (plain JAX) for sanity checks
# ----------------------------------------------------------------------------
def _ref_cls_seg(feat_nchw, weight, bias):
    # 1x1 conv NCHW: out[b,n,h,w] = sum_c feat[b,c,h,w] * weight[n,c] + bias[n]
    out = jnp.einsum("bchw,nc->bnhw", feat_nchw, weight)
    return out + bias[None, :, None, None]


if __name__ == "__main__":
    # ---- Test 1: small shapes consistent with the head (batch-blocked path) --
    batch_size = 2
    num_clips = 2
    channels = 32
    in_channels = channels
    num_classes = 8
    H = W = 16

    head = BaseDecodeHeadClipsPallas(
        in_channels, channels, num_classes=num_classes,
        dropout_ratio=0.1, in_index=-1, num_clips=num_clips)

    key = jax.random.PRNGKey(0)
    k1, k2 = jax.random.split(key)
    # Multi-level feature list (decode head selects in_index=-1); each level is
    # NCHW with B = batch_size * num_clips frames stacked on the batch axis.
    feats = [
        jax.random.normal(k1, (batch_size * num_clips, channels, H, W),
                          dtype=jnp.float32),
        jax.random.normal(k2, (batch_size * num_clips, channels, H, W),
                          dtype=jnp.float32),
    ]

    out = head.forward(feats, batch_size, num_clips)
    out = jax.block_until_ready(out)

    ref = _ref_cls_seg(feats[-1], head.conv_seg_weight, head.conv_seg_bias)
    assert out.shape == (batch_size * num_clips, num_classes, H, W), out.shape
    assert jnp.allclose(out, ref, atol=1e-5, rtol=1e-5), float(
        jnp.max(jnp.abs(out - ref)))

    # ---- Test 2: edge-tile path (B=1, HW not a multiple of 128, N not a ------
    # multiple of 8, bf16 features exercising the weight-dtype cast).
    head2 = BaseDecodeHeadClipsPallas(
        20, 20, num_classes=7, dropout_ratio=0.1, in_index=-1, num_clips=1)
    k3 = jax.random.PRNGKey(1)
    feat2 = jax.random.normal(k3, (1, 20, 18, 18), dtype=jnp.float32)
    out2 = jax.block_until_ready(
        head2.forward([feat2.astype(jnp.bfloat16)], 1, 1))
    ref2 = _ref_cls_seg(feat2, head2.conv_seg_weight, head2.conv_seg_bias)
    assert out2.shape == (1, 7, 18, 18), out2.shape
    assert jnp.allclose(out2.astype(jnp.float32), ref2, atol=1e-2, rtol=1e-2), \
        float(jnp.max(jnp.abs(out2.astype(jnp.float32) - ref2)))

    print("KERNEL_OK")
</pallas_src>

<mosaic_0001>
module attributes {stable_mosaic.version = 11 : i64} {
  func.func @_cls_seg_kernel(%arg0: i32, %arg1: i32, %arg2: memref<2x32x256xf32, #tpu.memory_space<vmem>>, %arg3: memref<8x32xf32, #tpu.memory_space<vmem>>, %arg4: memref<8x1xf32, #tpu.memory_space<vmem>>, %arg5: memref<2x8x256xf32, #tpu.memory_space<vmem>>) attributes {dimension_semantics = [#tpu.dimension_semantics<parallel>, #tpu.dimension_semantics<parallel>], iteration_bounds = array<i64: 2, 1>, scalar_prefetch = 0 : i64, scratch_operands = 0 : i64, tpu.core_type = #tpu.core_type<tc>, window_params = [{transform_indices = @transform_0, window_bounds = array<i64: 2, 32, 256>}, {pipeline_mode = #tpu.pipeline_mode<synchronous>, transform_indices = @transform_1, window_bounds = array<i64: 8, 32>}, {pipeline_mode = #tpu.pipeline_mode<synchronous>, transform_indices = @transform_2, window_bounds = array<i64: 8, 1>}, {transform_indices = @transform_3, window_bounds = array<i64: 2, 8, 256>}]} {
    %c0 = arith.constant 0 : index
    %c0_0 = arith.constant 0 : index
    %0 = vector.load %arg3[%c0, %c0_0] : memref<8x32xf32, #tpu.memory_space<vmem>>, vector<8x32xf32>
    %c0_1 = arith.constant 0 : index
    %c0_2 = arith.constant 0 : index
    %1 = vector.load %arg4[%c0_1, %c0_2] : memref<8x1xf32, #tpu.memory_space<vmem>>, vector<8x1xf32>
    %c0_3 = arith.constant 0 : index
    %c0_4 = arith.constant 0 : index
    %c0_5 = arith.constant 0 : index
    %2 = vector.load %arg2[%c0_3, %c0_4, %c0_5] : memref<2x32x256xf32, #tpu.memory_space<vmem>>, vector<1x32x256xf32>
    %3 = vector.shape_cast %2 : vector<1x32x256xf32> to vector<32x256xf32>
    %cst = arith.constant dense<0.000000e+00> : vector<8x256xf32>
    %4 = tpu.matmul %0, %3, %cst {dimension_numbers = #tpu.dot_dimension_numbers<[1], [0], [0], [1], [0, 0, 1, 1], [], []>} : vector<8x32xf32>, vector<32x256xf32>, vector<8x256xf32> -> vector<8x256xf32>
    %5 = vector.broadcast %1 : vector<8x1xf32> to vector<8x256xf32>
    %6 = arith.addf %4, %5 : vector<8x256xf32>
    %c0_6 = arith.constant 0 : index
    %c0_7 = arith.constant 0 : index
    %c0_8 = arith.constant 0 : index
    %7 = vector.load %arg5[%c0_6, %c0_7, %c0_8] : memref<2x8x256xf32, #tpu.memory_space<vmem>>, vector<1x8x256xf32>
    %8 = vector.shape_cast %7 : vector<1x8x256xf32> to vector<8x256xf32>
    %9 = vector.shape_cast %6 : vector<8x256xf32> to vector<1x8x256xf32>
    tpu.vector_store %arg5[%c0_6, %c0_7, %c0_8], %9 {strides = array<i32>} : memref<2x8x256xf32, #tpu.memory_space<vmem>>, vector<1x8x256xf32>,
    %c1 = arith.constant 1 : index
    %c0_9 = arith.constant 0 : index
    %c0_10 = arith.constant 0 : index
    %10 = vector.load %arg2[%c1, %c0_9, %c0_10] : memref<2x32x256xf32, #tpu.memory_space<vmem>>, vector<1x32x256xf32>
    %11 = vector.shape_cast %10 : vector<1x32x256xf32> to vector<32x256xf32>
    %cst_11 = arith.constant dense<0.000000e+00> : vector<8x256xf32>
    %12 = tpu.matmul %0, %11, %cst_11 {dimension_numbers = #tpu.dot_dimension_numbers<[1], [0], [0], [1], [0, 0, 1, 1], [], []>} : vector<8x32xf32>, vector<32x256xf32>, vector<8x256xf32> -> vector<8x256xf32>
    %13 = vector.broadcast %1 : vector<8x1xf32> to vector<8x256xf32>
    %14 = arith.addf %12, %13 : vector<8x256xf32>
    %c1_12 = arith.constant 1 : index
    %c0_13 = arith.constant 0 : index
    %c0_14 = arith.constant 0 : index
    %15 = vector.load %arg5[%c1_12, %c0_13, %c0_14] : memref<2x8x256xf32, #tpu.memory_space<vmem>>, vector<1x8x256xf32>
    %16 = vector.shape_cast %15 : vector<1x8x256xf32> to vector<8x256xf32>
    %17 = vector.shape_cast %14 : vector<8x256xf32> to vector<1x8x256xf32>
    tpu.vector_store %arg5[%c1_12, %c0_13, %c0_14], %17 {strides = array<i32>} : memref<2x8x256xf32, #tpu.memory_space<vmem>>, vector<1x8x256xf32>,
    return
  }
  func.func @transform_0(%arg0: i32, %arg1: i32) -> (i32, i32, i32) {
    %c0_i32 = arith.constant 0 : i32
    %c0_i32_0 = arith.constant 0 : i32
    return %arg0, %c0_i32, %arg1 : i32, i32, i32
  }
  func.func @transform_1(%arg0: i32, %arg1: i32) -> (i32, i32) {
    %c0_i32 = arith.constant 0 : i32
    %c0_i32_0 = arith.constant 0 : i32
    %c0_i32_1 = arith.constant 0 : i32
    return %c0_i32, %c0_i32_0 : i32, i32
  }
  func.func @transform_2(%arg0: i32, %arg1: i32) -> (i32, i32) {
    %c0_i32 = arith.constant 0 : i32
    %c0_i32_0 = arith.constant 0 : i32
    %c0_i32_1 = arith.constant 0 : i32
    return %c0_i32, %c0_i32_0 : i32, i32
  }
  func.func @transform_3(%arg0: i32, %arg1: i32) -> (i32, i32, i32) {
    %c0_i32 = arith.constant 0 : i32
    %c0_i32_0 = arith.constant 0 : i32
    return %arg0, %c0_i32, %arg1 : i32, i32, i32
  }
}

</mosaic_0001>

<bundles_post_ra>
// kernel: tpu_custom_call.1
= control target key start
LH: loop header
LB: loop body
LE: loop exit
PB: predicated region body
PF: predicated region fallthrough
CT: control target
= control target key end

     0   :  { %8 = vsyncpa [#allocation3], 0  ;;  %s827_s0 = inlined_call_operand.hbm [shape: f32[4,32,256], index: 0, kind: input, shape index: {}]   ;;  %s828_s1 = inlined_call_operand.vmem [shape: f32[8,32], index: 1, kind: input, shape index: {}]   ;;  %s829_s2 = inlined_call_operand.vmem [shape: f32[8,1], index: 2, kind: input, shape index: {}]   ;;  %s830_s3 = inlined_call_operand.hbm [shape: f32[4,8,256], index: 3, kind: output, shape index: {}]  }
   0x1   :  { %10 = vsyncpa [#allocation3 + $0x1], 0 }
   0x2   :  { %11 = vsyncpa [#allocation4], 0 }
   0x3   :  { %13 = vsyncpa [#allocation4 + $0x1], 0  ;;  %s675_s12 = smov 0   ;;  %s677_s13 = smov 0  }
   0x4   :  { %s679_s14 = smov 0   ;;  %s681_s15 = smov 0  }
   0x5   :  { %s683_s16 = smov 0   ;;  %s685_s17 = smov 0  }
   0x6 LB: > { %s433_s18 = sadd.s32 4294967295, %s648_s17   ;;  %s434_s19 = sadd.s32 4294967294, %s648_s17   ;;  %s648_s17 = sphi %s685_s17, %s19_s17   ;;  %s644_s16 = sphi %s683_s16, %s839_s16   ;;  %s640_s15 = sphi %s681_s15, %s838_s15   ;;  %s636_s14 = sphi %s679_s14, %s837_s14   ;;  %s632_s13 = sphi %s677_s13, %s836_s13   ;;  %s628_s12 = sphi %s675_s12, %s835_s12  }
   0x7   : > { %s31_s20 = sadd.s32 1, %s644_s16  ;;  %s40_s21 = sadd.s32 1, %s636_s14 }
   0x8   : > { %p33_p0 = scmp.ge.s32.totalorder %s31_s20, 2  ;;  %p47_p1 = scmp.ne.s32.totalorder %s636_s14, %s632_s13 }
   0x9   : > { %p48_p2 = scmp.eq.s32.totalorder %s648_s17, 0  ;;  %p53_p3 = scmp.ne.s32.totalorder %s632_s13, %s628_s12 }
   0xa   : > { %s841_s20 = smov (%p33_p0, %s31_s20), 0  ;;  %p54_p5 = scmp.eq.s32.totalorder %s433_s18, 0 }
   0xb   : > { %p716_p4 = por %p48_p2, %p47_p1  ;;  %s35_s23 = ssub.s32 %s644_s16, %s841_s20 }
   0xc   : > { %p121_p6 = scmp.eq.s32.totalorder %s433_s18, 1  ;;  %p38_p7 = scmp.eq.s32.totalorder %s35_s23, 0 }
   0xd   : > { %p722_p8 = por %p54_p5, %p53_p3  ;;  %p127_p10 = scmp.eq.s32.totalorder %s434_s19, 1 }
   0xe   : > { %p726_p9 = por %p121_p6, %p47_p1  ;;  %p436_p12 = scmp.ge.s32.totalorder %s648_s17, 2 }
   0xf   : > { %s731_s26 = scalar_select %p38_p7, %s636_s14, %s40_s21  }
  0x10   : > { %p733_p11 = por %p127_p10, %p53_p3  ;;  %p480_p13 = scmp.lt.s32.totalorder %s648_s17, 2 }
  0x11   : > { %s153_s28 = sand.u32 1, %s636_s14   ;;  %s465_s30 = sshll.u32 %s644_s16, 7 }
  0x12   : > { %s437_s29 = sshll.u32 %s153_s28, 7  ;;  %s165_s6 = scalar_lea.hbm %s827_s0, %s465_s30 }
  0x13   : > { %s157_s7 = scalar_lea.vmem [#allocation2], %s437_s29  ;;  %s166_s9 = sshll.u32 %s165_s6, 4  ;;  %s167_s9 = int_to_ptr.hbm [resolvable:$true] %s166_s9 }
  0x14   : > { %s168_s8 = sshll.u32 %s157_s7, 4  ;;  %p473_p0 = pnand %p480_p13, %p716_p4  ;;  %s169_s8 = int_to_ptr.vmem [resolvable:$true] %s168_s8 }
  0x15   : > { %p441_p1 = scmp.ge.s32.totalorder %s648_s17, 1  ;;  %s154_s10 = scalar_lea.sflag [#allocation3], %s153_s28 }
  0x16   : > { %s650_s11 = smov 256   ;;  %s651_s18 = smov 16  }
  0x17   : > { %475 = dma.hbm_to_vmem [thread:$0]  (!%p473_p0), %s167_s9, 2048, %s169_s8, %s154_s10, %s650_s11, %s650_s11, %s651_s18  }
  0x18   : > { %p176_p2 = scmp.lt.s32.totalorder %s648_s17, 3 }
  0x1a   : > { %p177_p3 = pnand %p441_p1, %p176_p2 }
  0x1b   : > { %s749_s19 = sand.u32 (!%p177_p3), 1, %s632_s13  }
  0x1c   : > { %180 = sbr.rel (%p177_p3) target bundleno = 181 (0xb5), region = 32  ;;  %s442_s21 = sshll.u32 (!%p177_p3), %s749_s19, 7 }
  0x1d   : > { %s183_s23 = scalar_lea.sflag (!%p177_p3), [#allocation3], %s749_s19  ;;  %s753_s29 = scalar_lea.vmem (!%p177_p3), [#allocation2], %s442_s21 }
  0x21   : > { %619 = dma.done.wait (%p722_p8), %s183_s23, 2048  }
  0x22   : > { %621 = vsyncadd (%p722_p8), %s183_s23, 4294965248  ;;  %v652_v0 = vmov 0   ;;  %v452_v1 = vld [vmem:[%s753_s29 + $0x70] sm:$0xff]  ;;  %v453_v2 = vld [vmem:[%s753_s29 + $0x78] sm:$0xff]  ;;  %vm229_vm0 = vcmask 261120   ;;  %s443_s4 = sshll.u32 %s749_s19, 5 }
  0x23   : > { %535 = vset.pattern.permute.xlu0 %v652_v0  ;;  %v450_v3 = vld [vmem:[%s753_s29 + $0x60] sm:$0xff]  ;;  %296 = vmatpush.msra.mxu2 %v452_v1  ;;  %v451_v4 = vld [vmem:[%s753_s29 + $0x68] sm:$0xff]  ;;  %v448_v5 = vld [vmem:[%s753_s29 + $0x50] sm:$0xff]  ;;  %s467_s5 = sshll.u32 %s640_s15, 5  ;;  %s209_s9 = scalar_lea.vmem [#allocation5], %s443_s4 }
  0x24   : > { %316 = vmatpush.msra.mxu3 %v453_v2  ;;  %v449_v6 = vld [vmem:[%s753_s29 + $0x58] sm:$0xff]  ;;  %v222_v7 = vld [vmem:[%s753_s29 + $0x30] sm:$0xff]  ;;  %v220_v9 = vld [vmem:[%s753_s29 + $0x20] sm:$0xff]  ;;  %s342_s8 = scalar_lea.hbm %s830_s3, %s467_s5  ;;  %s343_s10 = sshll.u32 %s209_s9, 4  ;;  %s790_s10 = int_to_ptr.vmem [resolvable:$true] %s343_s10 }
  0x25   : > { %v223_v8 = vld [vmem:[%s753_s29 + $0x38] sm:$0xff]  ;;  %297 = vmatpush.msra.mxu2 %v450_v3  ;;  %245 = vmatpush.msra.mxu0 %v222_v7  ;;  %v446_v10 = vld [vmem:[%s753_s29 + $0x40] sm:$0xff]  ;;  %v447_v11 = vld [vmem:[%s753_s29 + $0x48] sm:$0xff]  ;;  %s345_s11 = sshll.u32 %s342_s8, 4  ;;  %s328_s15 = scalar_lea.sflag [#allocation4], %s749_s19  ;;  %s346_s11 = int_to_ptr.hbm [resolvable:$true] %s345_s11 }
  0x26   : > { %317 = vmatpush.msra.mxu3 %v451_v4  ;;  %265 = vmatpush.msra.mxu1 %v223_v8  ;;  %v221_v12 = vld [vmem:[%s753_s29 + $0x28] sm:$0xff]  ;;  %v214_v13 = vld [vmem:[%s828_s1] sm:$0xff]  ;;  %v218_v14 = vld [vmem:[%s753_s29 + $0x10] sm:$0xff]  ;;  %s580_s18 = sshra.s32 %s346_s11, 4  ;;  %s586_s22 = scalar_lea.hbm %s830_s3, 64  ;;  %s581_s18 = int_to_ptr.hbm [resolvable:$true] %s580_s18 }
  0x27   : > { %298 = vmatpush.msra.mxu2 %v448_v5  ;;  %246 = vmatpush.msra.mxu0 %v220_v9  ;;  %v219_v15 = vld [vmem:[%s753_s29 + $0x18] sm:$0xff]  ;;  %v215_v16 = vld [vmem:[%s829_s2] sm:$0xff]  ;;  %v217_v18 = vld [vmem:[%s753_s29 + $0x8] sm:$0xff]  ;;  %s582_s21 = scalar_lea.hbm %s581_s18, 32  ;;  %p587_p7 = scmp.lt.s32.totalorder %s581_s18, %s830_s3 }
  0x28   : > { %318 = vmatpush.msra.mxu3 %v449_v6  ;;  %266 = vmatpush.msra.mxu1 %v221_v12  ;;  %v216_v17 = vld [vmem:[%s753_s29] sm:$0xff]  ;;  %p583_p4 = scmp.ne.s32.totalorder %s581_s18, %s582_s21  ;;  %p588_p8 = scmp.lt.s32.totalorder %s586_s22, %s582_s21 }
  0x29   : > { %299 = vmatpush.msra.mxu2 %v446_v10  ;;  %247 = vmatpush.msra.mxu0 %v218_v14 }
  0x2a   : > { %319 = vmatpush.msra.mxu3 %v447_v11  ;;  %454 = vmatmul.msk.f32.vlgmr.msra.gmra.mxu2 %vm229_vm0, %v214_v13  ;;  %p584_p5 = pnand %p583_p4, %p726_p9  ;;  %p589_p10 = por %p588_p8, %p587_p7 }
  0x2b   : > { %455 = vmatmul.msk.f32.vlgmr.msra.gmra.mxu3 %vm229_vm0, %v214_v13  ;;  %267 = vmatpush.msra.mxu1 %v219_v15 }
  0x2c   : > { %226 = vperm.xlu0 %535, %v215_v16   ;;  %248 = vmatpush.msra.mxu0 %v216_v17  ;;  %p585_p6 = pneg %p584_p5 }
  0x2d   : > { %268 = vmatpush.msra.mxu1 %v217_v18  ;;  %444 = vmatmul.msk.f32.vlgmr.msra.gmra.mxu0 %vm229_vm0, %v214_v13 }
  0x2e   : > { %445 = vmatmul.msk.f32.vlgmr.msra.gmra.mxu1 %vm229_vm0, %v214_v13  ;;  %p590_p13 = pnand %p589_p10, %p585_p6 }
  0x9e   : > { %v227_v19 = vpop.permute.xlu0 %226 }
  0xaa   : > { %v250_v20 = vpop.f32.mrf.mxu0 }
  0xab   : > { %v270_v21 = vpop.f32.mrf.mxu1  ;;  %v251_v22 = vadd.f32 %v250_v20, %v227_v19 }
  0xac   : > { %v271_v23 = vadd.f32 %v270_v21, %v227_v19 }
  0xad   : > { %v301_v24 = vpop.f32.mrf.mxu2  ;;  %273 = vst [vmem:[%s209_s9] sm:$0xff] %v251_v22 }
  0xae   : > { %v321_v25 = vpop.f32.mrf.mxu3  ;;  %v302_v26 = vadd.f32 %v301_v24, %v227_v19  ;;  %274 = vst [vmem:[%s209_s9 + $0x8] sm:$0xff] %v271_v23 }
  0xaf   : > { %v322_v27 = vadd.f32 %v321_v25, %v227_v19 }
  0xb0   : > { %456 = vst [vmem:[%s209_s9 + $0x10] sm:$0xff] %v302_v26 }
  0xb1   : > { %457 = vst [vmem:[%s209_s9 + $0x18] sm:$0xff] %v322_v27 }
  0xb2   : > { %593 = shalt.err (!%p590_p13)
}
  0xb3   : > { %s653_s19 = smov 256   ;;  %s654_s30 = smov 16  }
  0xb4   : > { %470 = dma.vmem_to_hbm [thread:$0]  (%p726_p9), %s790_s10, 512, %s346_s11, %s328_s15, %s653_s19, %s653_s19, %s654_s30  }
  0xb5 PF: > { %s360_s4 = sand.u32 1, %s628_s12   ;;  %p477_p0 = pnand %p436_p12, %p733_p11 }
  0xb6   : > { %s361_s5 = scalar_lea.sflag [#allocation4], %s360_s4 }
  0xb7   : > { %p478_p1 = pneg %p477_p0 }
  0xb9   : > { %623 = dma.done.wait (%p478_p1), %s361_s5, 512  }
  0xba   : > { %625 = vsyncadd (%p478_p1), %s361_s5, 4294966784  ;;  %s19_s17 = sadd.s32 1, %s648_s17   ;;  %s835_s12 = smov %s632_s13 }
  0xbb   : > { %p16_p2 = scmp.ge.s32.totalorder %s19_s17, 4   ;;  %s836_s13 = smov %s636_s14 }
  0xbc   : > { %s837_s14 = smov %s731_s26  ;;  %s838_s15 = smov %s644_s16 }
  0xbd   : > { %s839_s16 = smov %s841_s20  ;;  %18 = sbr.rel (!%p16_p2) target bundleno = 6 (0x6), region = 79 }
  0xc2   :  { %367 = vsyncpa [#allocation3], 1 }
  0xc3   :  { %369 = vsyncpa [#allocation3 + $0x1], 1 }
  0xc4   :  { %370 = vsyncpa [#allocation4], 1 }
  0xc5   :  { %372 = vsyncpa [#allocation4 + $0x1], 1 }

</bundles_post_ra>
